<compile_context>
chip_gen: v5e
topology: v5e:2x2
jax: 0.10.0
libtpu: 0.0.40
codegen_flags: <defaults>
</compile_context>

<pallas_src>
import functools

import jax
import jax.numpy as jnp
from jax import lax
from jax.experimental import pallas as pl
from jax.experimental.pallas import tpu as pltpu


# ---- packed-parameter layout -------------------------------------------------
# f32 vector table `tab`: (32, 128); each row is a 128-lane zero-padded vector.
ROW_FW1_0, ROW_FW1_1 = 0, 1            # feature Linear(2, 64) weight rows
ROW_FB1, ROW_FG1, ROW_FBE1 = 2, 3, 4   # bias / LN gamma / LN beta
ROW_FB2, ROW_FG2, ROW_FBE2 = 5, 6, 7
ROW_SW1 = 8                            # rows 8..12: summary Linear(5, 16) weight rows
ROW_SB1, ROW_SG1, ROW_SBE1 = 13, 14, 15
ROW_SB2, ROW_SG2, ROW_SBE2 = 16, 17, 18
ROW_RB1, ROW_RG1, ROW_RBE1 = 19, 20, 21
ROW_RW2T, ROW_RB2 = 22, 23             # regressor Linear(32, 1): W^T row and bias
ROW_ONES64, ROW_ONES16, ROW_ONES32 = 24, 25, 26   # lane masks for padded LayerNorm
TAB_ROWS = 32

# bf16 MXU weight slab `slab`: (4, 128, 128); each plane zero-padded to 128x128.
SLAB_FW2, SLAB_SW2, SLAB_RW1A, SLAB_RW1B = 0, 1, 2, 3

_ROWS_TARGET = 1024      # agent rows of (., 128) f32 intermediates per grid step


def _ceil_to(x, m):
    return ((x + m - 1) // m) * m


def _encoder_kernel(act_ref, tab_ref, slab_ref, out_ref, *, tile_b, a_pad):
    f32, bf16 = jnp.float32, jnp.bfloat16
    rows = tile_b * a_pad

    def trow(r):                              # (1, 128) f32, full-lane static slice
        return tab_ref[r:r + 1, :]

    def ln(x, g_row, b_row, ones_row, width):
        # LayerNorm over the first `width` lanes of a 128-lane value whose padded
        # lanes are exactly zero; padded lanes come out zero again (g, b padded 0).
        inv_w = 1.0 / float(width)
        mu = jnp.sum(x, axis=-1, keepdims=True) * inv_w
        xc = (x - mu) * ones_row
        var = jnp.sum(xc * xc, axis=-1, keepdims=True) * inv_w
        return xc * lax.rsqrt(var + 1e-5) * g_row + b_row

    act = act_ref[...]                                       # (tile_b, a_pad+8, 8) f32
    x = act[:, :a_pad, :].reshape(rows, 8)                   # agent rows (tile-aligned)
    x0, x1, m = x[:, 0:1], x[:, 1:2], x[:, 2:3]

    # ---- feature_extractor: MLP(2 -> 64), 128-lane padded ---------------------
    # Linear(2, 64) as VPU rank-1 updates (no padded K=2 MXU pass).
    h = x0 * trow(ROW_FW1_0) + x1 * trow(ROW_FW1_1) + trow(ROW_FB1)
    h = jnp.maximum(h, 0.0)
    h = ln(h, trow(ROW_FG1), trow(ROW_FBE1), trow(ROW_ONES64), 64)
    # Linear(64, 64) on the MXU (bf16 operands, f32 accumulation).
    h = jnp.dot(h.astype(bf16), slab_ref[SLAB_FW2], preferred_element_type=f32)
    h = jnp.maximum(h + trow(ROW_FB2), 0.0)
    feats = ln(h, trow(ROW_FG2), trow(ROW_FBE2), trow(ROW_ONES64), 64)   # (rows, 128)

    # ---- masked mean pool over the agent axis (VPU mul + sublane reduce) ------
    feats3 = feats.reshape(tile_b, a_pad, 128)
    mask3 = m.reshape(tile_b, a_pad, 1)
    psum = jnp.sum(feats3 * mask3, axis=1)                   # (tile_b, 128)
    cnt = jnp.maximum(jnp.sum(mask3, axis=1), 1.0)           # (tile_b, 1), clamp(min=1)
    pooled = psum / cnt                                      # exact divide

    # ---- summary_processor: MLP(5 -> 16) ---------------------------------------
    s = act[:, a_pad, :]                                     # (tile_b, 8): summary lanes 0..4
    hs = trow(ROW_SB1)
    for k in range(5):                                       # K=5 rank-1 on the VPU
        hs = hs + s[:, k:k + 1] * trow(ROW_SW1 + k)
    hs = jnp.maximum(hs, 0.0)
    hs = ln(hs, trow(ROW_SG1), trow(ROW_SBE1), trow(ROW_ONES16), 16)
    hs = jnp.dot(hs.astype(bf16), slab_ref[SLAB_SW2], preferred_element_type=f32)
    hs = jnp.maximum(hs + trow(ROW_SB2), 0.0)
    sproc = ln(hs, trow(ROW_SG2), trow(ROW_SBE2), trow(ROW_ONES16), 16)  # (tile_b, 128)

    # ---- regressor on concat([pooled, sproc]) (concat folded into split W) ----
    r = (jnp.dot(pooled.astype(bf16), slab_ref[SLAB_RW1A], preferred_element_type=f32)
         + jnp.dot(sproc.astype(bf16), slab_ref[SLAB_RW1B], preferred_element_type=f32)
         + trow(ROW_RB1))
    r = jnp.maximum(r, 0.0)
    r = ln(r, trow(ROW_RG1), trow(ROW_RBE1), trow(ROW_ONES32), 32)       # (tile_b, 128)

    # Final Linear(32, 1): contract the feature axis so batches land along lanes
    # (lane-dense (8, tile_b) store; 8 identical sublanes fill the output tile).
    w2 = jnp.broadcast_to(trow(ROW_RW2T), (8, 128))
    res = lax.dot_general(w2, r, dimension_numbers=(((1,), (1,)), ((), ())),
                          preferred_element_type=f32)        # (8, tile_b)
    out_ref[...] = res + tab_ref[ROW_RB2:ROW_RB2 + 1, 0:1]


def init_params(key):
    """Deterministic synthetic parameters. Linear weights stored (in, out)."""
    ks = jax.random.split(key, 16)
    u = lambda k, shape, scale: (jax.random.uniform(k, shape, jnp.float32) - 0.5) * 2 * scale
    p = {}
    # feature_extractor: Linear(2,64), LN(64), Linear(64,64), LN(64)
    p["fw1"] = u(ks[0], (2, 64), 1 / jnp.sqrt(2.0));  p["fb1"] = u(ks[1], (1, 64), 1 / jnp.sqrt(2.0))
    p["fg1"] = jnp.ones((1, 64), jnp.float32);        p["fbe1"] = jnp.zeros((1, 64), jnp.float32)
    p["fw2"] = u(ks[2], (64, 64), 1 / 8.0);           p["fb2"] = u(ks[3], (1, 64), 1 / 8.0)
    p["fg2"] = jnp.ones((1, 64), jnp.float32);        p["fbe2"] = jnp.zeros((1, 64), jnp.float32)
    # summary_processor: Linear(5,16), LN(16), Linear(16,16), LN(16)
    p["sw1"] = u(ks[4], (5, 16), 1 / jnp.sqrt(5.0));  p["sb1"] = u(ks[5], (1, 16), 1 / jnp.sqrt(5.0))
    p["sg1"] = jnp.ones((1, 16), jnp.float32);        p["sbe1"] = jnp.zeros((1, 16), jnp.float32)
    p["sw2"] = u(ks[6], (16, 16), 0.25);              p["sb2"] = u(ks[7], (1, 16), 0.25)
    p["sg2"] = jnp.ones((1, 16), jnp.float32);        p["sbe2"] = jnp.zeros((1, 16), jnp.float32)
    # regressor: Linear(80,32) split into (64,32)+(16,32), LN(32), Linear(32,1)
    rw1 = u(ks[8], (80, 32), 1 / jnp.sqrt(80.0))
    p["rw1a"] = rw1[:64];                             p["rw1b"] = rw1[64:]
    p["rb1"] = u(ks[9], (1, 32), 1 / jnp.sqrt(80.0))
    p["rg1"] = jnp.ones((1, 32), jnp.float32);        p["rbe1"] = jnp.zeros((1, 32), jnp.float32)
    p["rw2"] = u(ks[10], (32, 1), 1 / jnp.sqrt(32.0)); p["rb2"] = u(ks[11], (1, 1), 1 / jnp.sqrt(32.0))
    return p


def pack_params(p):
    """Pack the 23 logical parameter arrays into 2 kernel buffers (tab f32, slab bf16)."""
    tab = jnp.zeros((TAB_ROWS, 128), jnp.float32)

    def put(t, r, v):
        v = jnp.asarray(v, jnp.float32).reshape(-1)
        return t.at[r, :v.shape[0]].set(v)

    tab = put(tab, ROW_FW1_0, p["fw1"][0])
    tab = put(tab, ROW_FW1_1, p["fw1"][1])
    for r, name in ((ROW_FB1, "fb1"), (ROW_FG1, "fg1"), (ROW_FBE1, "fbe1"),
                    (ROW_FB2, "fb2"), (ROW_FG2, "fg2"), (ROW_FBE2, "fbe2"),
                    (ROW_SB1, "sb1"), (ROW_SG1, "sg1"), (ROW_SBE1, "sbe1"),
                    (ROW_SB2, "sb2"), (ROW_SG2, "sg2"), (ROW_SBE2, "sbe2"),
                    (ROW_RB1, "rb1"), (ROW_RG1, "rg1"), (ROW_RBE1, "rbe1"),
                    (ROW_RB2, "rb2")):
        tab = put(tab, r, p[name])
    for k in range(5):
        tab = put(tab, ROW_SW1 + k, p["sw1"][k])
    tab = put(tab, ROW_RW2T, p["rw2"][:, 0])
    tab = tab.at[ROW_ONES64, :64].set(1.0)
    tab = tab.at[ROW_ONES16, :16].set(1.0)
    tab = tab.at[ROW_ONES32, :32].set(1.0)

    slab = jnp.zeros((4, 128, 128), jnp.float32)
    slab = slab.at[SLAB_FW2, :64, :64].set(p["fw2"])
    slab = slab.at[SLAB_SW2, :16, :16].set(p["sw2"])
    slab = slab.at[SLAB_RW1A, :64, :32].set(p["rw1a"])
    slab = slab.at[SLAB_RW1B, :16, :32].set(p["rw1b"])
    return {"tab": tab, "slab": slab.astype(jnp.bfloat16)}


def underwater_encoder(basic, mask, summary, packed):
    """basic: (B, A, 2) f32, mask: (B, A) bool, summary: (B, 5) f32 -> (B, 1) f32."""
    B, A, _ = basic.shape
    a_pad = _ceil_to(max(A, 1), 8)                          # keep agent reshapes tile-aligned
    tile_b = max(1, min(128, B, _ROWS_TARGET // a_pad))     # ~1k agent rows / step (v7x-safe)
    b_pad = _ceil_to(B, tile_b)
    grid_b = b_pad // tile_b

    # Fused activation slab: one input DMA per step.
    #   lanes 0-1: basic, lane 2: mask; row `a_pad` of each batch carries summary.
    act = jnp.zeros((b_pad, a_pad + 8, 8), jnp.float32)
    act = act.at[:B, :A, 0:2].set(basic.astype(jnp.float32))
    act = act.at[:B, :A, 2].set(mask.astype(jnp.float32))
    act = act.at[:B, a_pad, 0:5].set(summary.astype(jnp.float32))

    tab, slab = packed["tab"], packed["slab"]

    rows_total = b_pad * a_pad
    cost = pl.CostEstimate(
        flops=int(2 * rows_total * 128 * 128       # fw2 MXU
                  + 10 * rows_total * 128          # rank-1 layer-1 + pooling + LN
                  + 6 * b_pad * 128 * 128          # sw2 + rw1a + rw1b
                  + 2 * grid_b * 8 * 128 * tile_b),
        transcendentals=int(2 * rows_total + 5 * b_pad),
        bytes_accessed=int(act.size * 4 + tab.size * 4 + slab.size * 2
                           + grid_b * 8 * tile_b * 4),
    )

    kernel = functools.partial(_encoder_kernel, tile_b=tile_b, a_pad=a_pad)
    out = pl.pallas_call(
        kernel,
        grid=(grid_b,),
        in_specs=[
            pl.BlockSpec((tile_b, a_pad + 8, 8), lambda i: (i, 0, 0)),   # streamed per step
            pl.BlockSpec((TAB_ROWS, 128), lambda i: (0, 0)),             # constant: fetched once
            pl.BlockSpec((4, 128, 128), lambda i: (0, 0, 0)),            # constant: fetched once
        ],
        out_specs=pl.BlockSpec((8, tile_b), lambda i: (i, 0)),           # lane-dense store
        out_shape=jax.ShapeDtypeStruct((grid_b * 8, tile_b), jnp.float32),
        compiler_params=pltpu.CompilerParams(
            dimension_semantics=("parallel",),       # independent batch tiles (v7x 2-TC split)
            vmem_limit_bytes=32 * 1024 * 1024,       # explicit, fits all of v5e/v6e/v7x
        ),
        cost_estimate=cost,
    )(act, tab, slab)

    res = out.reshape(grid_b, 8, tile_b)[:, 0, :].reshape(b_pad, 1)
    return res[:B]


def _reference(basic, mask, summary, params):
    """Pure-JAX f32 reference mirroring the PyTorch forward."""
    def ln(x, g, b):
        mu = x.mean(-1, keepdims=True)
        var = ((x - mu) ** 2).mean(-1, keepdims=True)
        return (x - mu) / jnp.sqrt(var + 1e-5) * g + b

    B, A, _ = basic.shape
    h = jnp.maximum(basic.reshape(-1, 2) @ params["fw1"] + params["fb1"], 0.0)
    h = ln(h, params["fg1"], params["fbe1"])
    h = jnp.maximum(h @ params["fw2"] + params["fb2"], 0.0)
    feats = ln(h, params["fg2"], params["fbe2"]).reshape(B, A, 64)
    m = mask.astype(jnp.float32)
    proc = feats * m[:, :, None]
    pooled = proc.sum(1) / jnp.maximum(m.sum(1), 1.0)[:, None]
    hs = jnp.maximum(summary @ params["sw1"] + params["sb1"], 0.0)
    hs = ln(hs, params["sg1"], params["sbe1"])
    hs = jnp.maximum(hs @ params["sw2"] + params["sb2"], 0.0)
    sproc = ln(hs, params["sg2"], params["sbe2"])
    r = jnp.maximum(pooled @ params["rw1a"] + sproc @ params["rw1b"] + params["rb1"], 0.0)
    r = ln(r, params["rg1"], params["rbe1"])
    return r @ params["rw2"] + params["rb2"]


if __name__ == "__main__":
    key = jax.random.PRNGKey(0)
    k_basic, k_mask, k_summary, k_params, k_extra = jax.random.split(key, 5)

    params = init_params(k_params)
    packed = pack_params(params)

    # Case 1: tile-aligned toy shapes (B=2, A=8).
    B, A = 2, 8
    basic = jax.random.normal(k_basic, (B, A, 2), jnp.float32)
    mask = jax.random.uniform(k_mask, (B, A)) > 0.3          # bool mask
    summary = jax.random.normal(k_summary, (B, 5), jnp.float32)

    out = jax.block_until_ready(underwater_encoder(basic, mask, summary, packed))
    ref = _reference(basic, mask, summary, params)
    assert out.shape == (B, 1)
    assert bool(jnp.all(jnp.isfinite(out)))
    assert bool(jnp.allclose(out, ref, rtol=2e-2, atol=2e-2))

    # Case 2: unaligned shapes exercise the wrapper-side A/B padding (B=3, A=5).
    kb, km, ks = jax.random.split(k_extra, 3)
    B2, A2 = 3, 5
    basic2 = jax.random.normal(kb, (B2, A2, 2), jnp.float32)
    mask2 = jax.random.uniform(km, (B2, A2)) > 0.3
    summary2 = jax.random.normal(ks, (B2, 5), jnp.float32)

    out2 = jax.block_until_ready(underwater_encoder(basic2, mask2, summary2, packed))
    ref2 = _reference(basic2, mask2, summary2, params)
    assert out2.shape == (B2, 1)
    assert bool(jnp.all(jnp.isfinite(out2)))
    assert bool(jnp.allclose(out2, ref2, rtol=2e-2, atol=2e-2))

    print("KERNEL_OK")
</pallas_src>

<mosaic_0001>
module attributes {stable_mosaic.version = 11 : i64} {
  func.func @_encoder_kernel(%arg0: i32, %arg1: memref<2x16x8xf32, #tpu.memory_space<vmem>>, %arg2: memref<32x128xf32, #tpu.memory_space<vmem>>, %arg3: memref<4x128x128xbf16, #tpu.memory_space<vmem>>, %arg4: memref<8x2xf32, #tpu.memory_space<vmem>>) attributes {dimension_semantics = [#tpu.dimension_semantics<parallel>], iteration_bounds = array<i64: 1>, scalar_prefetch = 0 : i64, scratch_operands = 0 : i64, tpu.core_type = #tpu.core_type<tc>, window_params = [{transform_indices = @transform_0, window_bounds = array<i64: 2, 16, 8>}, {pipeline_mode = #tpu.pipeline_mode<synchronous>, transform_indices = @transform_1, window_bounds = array<i64: 32, 128>}, {pipeline_mode = #tpu.pipeline_mode<synchronous>, transform_indices = @transform_2, window_bounds = array<i64: 4, 128, 128>}, {transform_indices = @transform_3, window_bounds = array<i64: 8, 2>}]} {
    %c0 = arith.constant 0 : index
    %c0_0 = arith.constant 0 : index
    %c0_1 = arith.constant 0 : index
    %0 = vector.load %arg1[%c0, %c0_0, %c0_1] : memref<2x16x8xf32, #tpu.memory_space<vmem>>, vector<2x16x8xf32>
    %1 = vector.extract_strided_slice %0 {offsets = [0, 0, 0], sizes = [2, 8, 8], strides = [1, 1, 1]} : vector<2x16x8xf32> to vector<2x8x8xf32>
    %2 = vector.shape_cast %1 : vector<2x8x8xf32> to vector<16x8xf32>
    %3 = vector.extract_strided_slice %2 {offsets = [0, 0], sizes = [16, 1], strides = [1, 1]} : vector<16x8xf32> to vector<16x1xf32>
    %4 = vector.extract_strided_slice %2 {offsets = [0, 1], sizes = [16, 1], strides = [1, 1]} : vector<16x8xf32> to vector<16x1xf32>
    %5 = vector.extract_strided_slice %2 {offsets = [0, 2], sizes = [16, 1], strides = [1, 1]} : vector<16x8xf32> to vector<16x1xf32>
    %c0_2 = arith.constant 0 : index
    %c0_3 = arith.constant 0 : index
    %6 = vector.load %arg2[%c0_2, %c0_3] : memref<32x128xf32, #tpu.memory_space<vmem>>, vector<1x128xf32>
    %7 = vector.broadcast %3 : vector<16x1xf32> to vector<16x128xf32>
    %8 = vector.broadcast %6 : vector<1x128xf32> to vector<16x128xf32>
    %9 = arith.mulf %7, %8 : vector<16x128xf32>
    %c1 = arith.constant 1 : index
    %c0_4 = arith.constant 0 : index
    %10 = vector.load %arg2[%c1, %c0_4] : memref<32x128xf32, #tpu.memory_space<vmem>>, vector<1x128xf32>
    %11 = vector.broadcast %4 : vector<16x1xf32> to vector<16x128xf32>
    %12 = vector.broadcast %10 : vector<1x128xf32> to vector<16x128xf32>
    %13 = arith.mulf %11, %12 : vector<16x128xf32>
    %14 = arith.addf %9, %13 : vector<16x128xf32>
    %c2 = arith.constant 2 : index
    %c0_5 = arith.constant 0 : index
    %15 = vector.load %arg2[%c2, %c0_5] : memref<32x128xf32, #tpu.memory_space<vmem>>, vector<1x128xf32>
    %16 = vector.broadcast %15 : vector<1x128xf32> to vector<16x128xf32>
    %17 = arith.addf %14, %16 : vector<16x128xf32>
    %cst = arith.constant 0.000000e+00 : f32
    %18 = vector.broadcast %cst : f32 to vector<16x128xf32>
    %19 = arith.maximumf %17, %18 : vector<16x128xf32>
    %c3 = arith.constant 3 : index
    %c0_6 = arith.constant 0 : index
    %20 = vector.load %arg2[%c3, %c0_6] : memref<32x128xf32, #tpu.memory_space<vmem>>, vector<1x128xf32>
    %c4 = arith.constant 4 : index
    %c0_7 = arith.constant 0 : index
    %21 = vector.load %arg2[%c4, %c0_7] : memref<32x128xf32, #tpu.memory_space<vmem>>, vector<1x128xf32>
    %c24 = arith.constant 24 : index
    %c0_8 = arith.constant 0 : index
    %22 = vector.load %arg2[%c24, %c0_8] : memref<32x128xf32, #tpu.memory_space<vmem>>, vector<1x128xf32>
    %cst_9 = arith.constant dense<0.000000e+00> : vector<16xf32>
    %23 = vector.multi_reduction <add>, %19, %cst_9 [1] : vector<16x128xf32> to vector<16xf32>
    %24 = vector.shape_cast %23 : vector<16xf32> to vector<16x1xf32>
    %cst_10 = arith.constant 1.562500e-02 : f32
    %25 = vector.broadcast %cst_10 : f32 to vector<16x1xf32>
    %26 = arith.mulf %24, %25 : vector<16x1xf32>
    %27 = vector.broadcast %26 : vector<16x1xf32> to vector<16x128xf32>
    %28 = arith.subf %19, %27 : vector<16x128xf32>
    %29 = vector.broadcast %22 : vector<1x128xf32> to vector<16x128xf32>
    %30 = arith.mulf %28, %29 : vector<16x128xf32>
    %31 = arith.mulf %30, %30 : vector<16x128xf32>
    %cst_11 = arith.constant dense<0.000000e+00> : vector<16xf32>
    %32 = vector.multi_reduction <add>, %31, %cst_11 [1] : vector<16x128xf32> to vector<16xf32>
    %33 = vector.shape_cast %32 : vector<16xf32> to vector<16x1xf32>
    %cst_12 = arith.constant 1.562500e-02 : f32
    %34 = vector.broadcast %cst_12 : f32 to vector<16x1xf32>
    %35 = arith.mulf %33, %34 : vector<16x1xf32>
    %cst_13 = arith.constant 9.99999974E-6 : f32
    %36 = vector.broadcast %cst_13 : f32 to vector<16x1xf32>
    %37 = arith.addf %35, %36 : vector<16x1xf32>
    %38 = math.rsqrt %37 : vector<16x1xf32>
    %39 = vector.broadcast %38 : vector<16x1xf32> to vector<16x128xf32>
    %40 = arith.mulf %30, %39 : vector<16x128xf32>
    %41 = vector.broadcast %20 : vector<1x128xf32> to vector<16x128xf32>
    %42 = arith.mulf %40, %41 : vector<16x128xf32>
    %43 = vector.broadcast %21 : vector<1x128xf32> to vector<16x128xf32>
    %44 = arith.addf %42, %43 : vector<16x128xf32>
    %45 = arith.truncf %44 : vector<16x128xf32> to vector<16x128xbf16>
    %c0_14 = arith.constant 0 : index
    %c0_15 = arith.constant 0 : index
    %c0_16 = arith.constant 0 : index
    %46 = vector.load %arg3[%c0_14, %c0_15, %c0_16] : memref<4x128x128xbf16, #tpu.memory_space<vmem>>, vector<1x128x128xbf16>
    %47 = vector.shape_cast %46 : vector<1x128x128xbf16> to vector<128x128xbf16>
    %cst_17 = arith.constant dense<0.000000e+00> : vector<16x128xf32>
    %48 = tpu.matmul %45, %47, %cst_17 {dimension_numbers = #tpu.dot_dimension_numbers<[1], [0], [0], [1], [0, 0, 1, 1], [], []>} : vector<16x128xbf16>, vector<128x128xbf16>, vector<16x128xf32> -> vector<16x128xf32>
    %c5 = arith.constant 5 : index
    %c0_18 = arith.constant 0 : index
    %49 = vector.load %arg2[%c5, %c0_18] : memref<32x128xf32, #tpu.memory_space<vmem>>, vector<1x128xf32>
    %50 = vector.broadcast %49 : vector<1x128xf32> to vector<16x128xf32>
    %51 = arith.addf %48, %50 : vector<16x128xf32>
    %cst_19 = arith.constant 0.000000e+00 : f32
    %52 = vector.broadcast %cst_19 : f32 to vector<16x128xf32>
    %53 = arith.maximumf %51, %52 : vector<16x128xf32>
    %c6 = arith.constant 6 : index
    %c0_20 = arith.constant 0 : index
    %54 = vector.load %arg2[%c6, %c0_20] : memref<32x128xf32, #tpu.memory_space<vmem>>, vector<1x128xf32>
    %c7 = arith.constant 7 : index
    %c0_21 = arith.constant 0 : index
    %55 = vector.load %arg2[%c7, %c0_21] : memref<32x128xf32, #tpu.memory_space<vmem>>, vector<1x128xf32>
    %c24_22 = arith.constant 24 : index
    %c0_23 = arith.constant 0 : index
    %56 = vector.load %arg2[%c24_22, %c0_23] : memref<32x128xf32, #tpu.memory_space<vmem>>, vector<1x128xf32>
    %cst_24 = arith.constant dense<0.000000e+00> : vector<16xf32>
    %57 = vector.multi_reduction <add>, %53, %cst_24 [1] : vector<16x128xf32> to vector<16xf32>
    %58 = vector.shape_cast %57 : vector<16xf32> to vector<16x1xf32>
    %cst_25 = arith.constant 1.562500e-02 : f32
    %59 = vector.broadcast %cst_25 : f32 to vector<16x1xf32>
    %60 = arith.mulf %58, %59 : vector<16x1xf32>
    %61 = vector.broadcast %60 : vector<16x1xf32> to vector<16x128xf32>
    %62 = arith.subf %53, %61 : vector<16x128xf32>
    %63 = vector.broadcast %56 : vector<1x128xf32> to vector<16x128xf32>
    %64 = arith.mulf %62, %63 : vector<16x128xf32>
    %65 = arith.mulf %64, %64 : vector<16x128xf32>
    %cst_26 = arith.constant dense<0.000000e+00> : vector<16xf32>
    %66 = vector.multi_reduction <add>, %65, %cst_26 [1] : vector<16x128xf32> to vector<16xf32>
    %67 = vector.shape_cast %66 : vector<16xf32> to vector<16x1xf32>
    %cst_27 = arith.constant 1.562500e-02 : f32
    %68 = vector.broadcast %cst_27 : f32 to vector<16x1xf32>
    %69 = arith.mulf %67, %68 : vector<16x1xf32>
    %cst_28 = arith.constant 9.99999974E-6 : f32
    %70 = vector.broadcast %cst_28 : f32 to vector<16x1xf32>
    %71 = arith.addf %69, %70 : vector<16x1xf32>
    %72 = math.rsqrt %71 : vector<16x1xf32>
    %73 = vector.broadcast %72 : vector<16x1xf32> to vector<16x128xf32>
    %74 = arith.mulf %64, %73 : vector<16x128xf32>
    %75 = vector.broadcast %54 : vector<1x128xf32> to vector<16x128xf32>
    %76 = arith.mulf %74, %75 : vector<16x128xf32>
    %77 = vector.broadcast %55 : vector<1x128xf32> to vector<16x128xf32>
    %78 = arith.addf %76, %77 : vector<16x128xf32>
    %79 = vector.shape_cast %78 : vector<16x128xf32> to vector<2x8x128xf32>
    %80 = vector.shape_cast %5 : vector<16x1xf32> to vector<2x8x1xf32>
    %81 = vector.broadcast %80 : vector<2x8x1xf32> to vector<2x8x128xf32>
    %82 = arith.mulf %79, %81 : vector<2x8x128xf32>
    %cst_29 = arith.constant dense<0.000000e+00> : vector<2x128xf32>
    %83 = vector.multi_reduction <add>, %82, %cst_29 [1] : vector<2x8x128xf32> to vector<2x128xf32>
    %cst_30 = arith.constant dense<0.000000e+00> : vector<2x1xf32>
    %84 = vector.multi_reduction <add>, %80, %cst_30 [1] : vector<2x8x1xf32> to vector<2x1xf32>
    %cst_31 = arith.constant 1.000000e+00 : f32
    %85 = vector.broadcast %cst_31 : f32 to vector<2x1xf32>
    %86 = arith.maximumf %84, %85 : vector<2x1xf32>
    %87 = vector.broadcast %86 : vector<2x1xf32> to vector<2x128xf32>
    %88 = arith.divf %83, %87 : vector<2x128xf32>
    %89 = vector.extract_strided_slice %0 {offsets = [0, 8, 0], sizes = [2, 1, 8], strides = [1, 1, 1]} : vector<2x16x8xf32> to vector<2x1x8xf32>
    %90 = vector.shape_cast %89 : vector<2x1x8xf32> to vector<2x8xf32>
    %c13 = arith.constant 13 : index
    %c0_32 = arith.constant 0 : index
    %91 = vector.load %arg2[%c13, %c0_32] : memref<32x128xf32, #tpu.memory_space<vmem>>, vector<1x128xf32>
    %92 = vector.extract_strided_slice %90 {offsets = [0, 0], sizes = [2, 1], strides = [1, 1]} : vector<2x8xf32> to vector<2x1xf32>
    %c8 = arith.constant 8 : index
    %c0_33 = arith.constant 0 : index
    %93 = vector.load %arg2[%c8, %c0_33] : memref<32x128xf32, #tpu.memory_space<vmem>>, vector<1x128xf32>
    %94 = vector.broadcast %92 : vector<2x1xf32> to vector<2x128xf32>
    %95 = vector.broadcast %93 : vector<1x128xf32> to vector<2x128xf32>
    %96 = arith.mulf %94, %95 : vector<2x128xf32>
    %97 = vector.broadcast %91 : vector<1x128xf32> to vector<2x128xf32>
    %98 = arith.addf %97, %96 : vector<2x128xf32>
    %99 = vector.extract_strided_slice %90 {offsets = [0, 1], sizes = [2, 1], strides = [1, 1]} : vector<2x8xf32> to vector<2x1xf32>
    %c9 = arith.constant 9 : index
    %c0_34 = arith.constant 0 : index
    %100 = vector.load %arg2[%c9, %c0_34] : memref<32x128xf32, #tpu.memory_space<vmem>>, vector<1x128xf32>
    %101 = vector.broadcast %99 : vector<2x1xf32> to vector<2x128xf32>
    %102 = vector.broadcast %100 : vector<1x128xf32> to vector<2x128xf32>
    %103 = arith.mulf %101, %102 : vector<2x128xf32>
    %104 = arith.addf %98, %103 : vector<2x128xf32>
    %105 = vector.extract_strided_slice %90 {offsets = [0, 2], sizes = [2, 1], strides = [1, 1]} : vector<2x8xf32> to vector<2x1xf32>
    %c10 = arith.constant 10 : index
    %c0_35 = arith.constant 0 : index
    %106 = vector.load %arg2[%c10, %c0_35] : memref<32x128xf32, #tpu.memory_space<vmem>>, vector<1x128xf32>
    %107 = vector.broadcast %105 : vector<2x1xf32> to vector<2x128xf32>
    %108 = vector.broadcast %106 : vector<1x128xf32> to vector<2x128xf32>
    %109 = arith.mulf %107, %108 : vector<2x128xf32>
    %110 = arith.addf %104, %109 : vector<2x128xf32>
    %111 = vector.extract_strided_slice %90 {offsets = [0, 3], sizes = [2, 1], strides = [1, 1]} : vector<2x8xf32> to vector<2x1xf32>
    %c11 = arith.constant 11 : index
    %c0_36 = arith.constant 0 : index
    %112 = vector.load %arg2[%c11, %c0_36] : memref<32x128xf32, #tpu.memory_space<vmem>>, vector<1x128xf32>
    %113 = vector.broadcast %111 : vector<2x1xf32> to vector<2x128xf32>
    %114 = vector.broadcast %112 : vector<1x128xf32> to vector<2x128xf32>
    %115 = arith.mulf %113, %114 : vector<2x128xf32>
    %116 = arith.addf %110, %115 : vector<2x128xf32>
    %117 = vector.extract_strided_slice %90 {offsets = [0, 4], sizes = [2, 1], strides = [1, 1]} : vector<2x8xf32> to vector<2x1xf32>
    %c12 = arith.constant 12 : index
    %c0_37 = arith.constant 0 : index
    %118 = vector.load %arg2[%c12, %c0_37] : memref<32x128xf32, #tpu.memory_space<vmem>>, vector<1x128xf32>
    %119 = vector.broadcast %117 : vector<2x1xf32> to vector<2x128xf32>
    %120 = vector.broadcast %118 : vector<1x128xf32> to vector<2x128xf32>
    %121 = arith.mulf %119, %120 : vector<2x128xf32>
    %122 = arith.addf %116, %121 : vector<2x128xf32>
    %cst_38 = arith.constant 0.000000e+00 : f32
    %123 = vector.broadcast %cst_38 : f32 to vector<2x128xf32>
    %124 = arith.maximumf %122, %123 : vector<2x128xf32>
    %c14 = arith.constant 14 : index
    %c0_39 = arith.constant 0 : index
    %125 = vector.load %arg2[%c14, %c0_39] : memref<32x128xf32, #tpu.memory_space<vmem>>, vector<1x128xf32>
    %c15 = arith.constant 15 : index
    %c0_40 = arith.constant 0 : index
    %126 = vector.load %arg2[%c15, %c0_40] : memref<32x128xf32, #tpu.memory_space<vmem>>, vector<1x128xf32>
    %c25 = arith.constant 25 : index
    %c0_41 = arith.constant 0 : index
    %127 = vector.load %arg2[%c25, %c0_41] : memref<32x128xf32, #tpu.memory_space<vmem>>, vector<1x128xf32>
    %cst_42 = arith.constant dense<0.000000e+00> : vector<2xf32>
    %128 = vector.multi_reduction <add>, %124, %cst_42 [1] : vector<2x128xf32> to vector<2xf32>
    %129 = vector.shape_cast %128 : vector<2xf32> to vector<2x1xf32>
    %cst_43 = arith.constant 6.250000e-02 : f32
    %130 = vector.broadcast %cst_43 : f32 to vector<2x1xf32>
    %131 = arith.mulf %129, %130 : vector<2x1xf32>
    %132 = vector.broadcast %131 : vector<2x1xf32> to vector<2x128xf32>
    %133 = arith.subf %124, %132 : vector<2x128xf32>
    %134 = vector.broadcast %127 : vector<1x128xf32> to vector<2x128xf32>
    %135 = arith.mulf %133, %134 : vector<2x128xf32>
    %136 = arith.mulf %135, %135 : vector<2x128xf32>
    %cst_44 = arith.constant dense<0.000000e+00> : vector<2xf32>
    %137 = vector.multi_reduction <add>, %136, %cst_44 [1] : vector<2x128xf32> to vector<2xf32>
    %138 = vector.shape_cast %137 : vector<2xf32> to vector<2x1xf32>
    %cst_45 = arith.constant 6.250000e-02 : f32
    %139 = vector.broadcast %cst_45 : f32 to vector<2x1xf32>
    %140 = arith.mulf %138, %139 : vector<2x1xf32>
    %cst_46 = arith.constant 9.99999974E-6 : f32
    %141 = vector.broadcast %cst_46 : f32 to vector<2x1xf32>
    %142 = arith.addf %140, %141 : vector<2x1xf32>
    %143 = math.rsqrt %142 : vector<2x1xf32>
    %144 = vector.broadcast %143 : vector<2x1xf32> to vector<2x128xf32>
    %145 = arith.mulf %135, %144 : vector<2x128xf32>
    %146 = vector.broadcast %125 : vector<1x128xf32> to vector<2x128xf32>
    %147 = arith.mulf %145, %146 : vector<2x128xf32>
    %148 = vector.broadcast %126 : vector<1x128xf32> to vector<2x128xf32>
    %149 = arith.addf %147, %148 : vector<2x128xf32>
    %150 = arith.truncf %149 : vector<2x128xf32> to vector<2x128xbf16>
    %c1_47 = arith.constant 1 : index
    %c0_48 = arith.constant 0 : index
    %c0_49 = arith.constant 0 : index
    %151 = vector.load %arg3[%c1_47, %c0_48, %c0_49] : memref<4x128x128xbf16, #tpu.memory_space<vmem>>, vector<1x128x128xbf16>
    %152 = vector.shape_cast %151 : vector<1x128x128xbf16> to vector<128x128xbf16>
    %cst_50 = arith.constant dense<0.000000e+00> : vector<2x128xf32>
    %153 = tpu.matmul %150, %152, %cst_50 {dimension_numbers = #tpu.dot_dimension_numbers<[1], [0], [0], [1], [0, 0, 1, 1], [], []>} : vector<2x128xbf16>, vector<128x128xbf16>, vector<2x128xf32> -> vector<2x128xf32>
    %c16 = arith.constant 16 : index
    %c0_51 = arith.constant 0 : index
    %154 = vector.load %arg2[%c16, %c0_51] : memref<32x128xf32, #tpu.memory_space<vmem>>, vector<1x128xf32>
    %155 = vector.broadcast %154 : vector<1x128xf32> to vector<2x128xf32>
    %156 = arith.addf %153, %155 : vector<2x128xf32>
    %cst_52 = arith.constant 0.000000e+00 : f32
    %157 = vector.broadcast %cst_52 : f32 to vector<2x128xf32>
    %158 = arith.maximumf %156, %157 : vector<2x128xf32>
    %c17 = arith.constant 17 : index
    %c0_53 = arith.constant 0 : index
    %159 = vector.load %arg2[%c17, %c0_53] : memref<32x128xf32, #tpu.memory_space<vmem>>, vector<1x128xf32>
    %c18 = arith.constant 18 : index
    %c0_54 = arith.constant 0 : index
    %160 = vector.load %arg2[%c18, %c0_54] : memref<32x128xf32, #tpu.memory_space<vmem>>, vector<1x128xf32>
    %c25_55 = arith.constant 25 : index
    %c0_56 = arith.constant 0 : index
    %161 = vector.load %arg2[%c25_55, %c0_56] : memref<32x128xf32, #tpu.memory_space<vmem>>, vector<1x128xf32>
    %cst_57 = arith.constant dense<0.000000e+00> : vector<2xf32>
    %162 = vector.multi_reduction <add>, %158, %cst_57 [1] : vector<2x128xf32> to vector<2xf32>
    %163 = vector.shape_cast %162 : vector<2xf32> to vector<2x1xf32>
    %cst_58 = arith.constant 6.250000e-02 : f32
    %164 = vector.broadcast %cst_58 : f32 to vector<2x1xf32>
    %165 = arith.mulf %163, %164 : vector<2x1xf32>
    %166 = vector.broadcast %165 : vector<2x1xf32> to vector<2x128xf32>
    %167 = arith.subf %158, %166 : vector<2x128xf32>
    %168 = vector.broadcast %161 : vector<1x128xf32> to vector<2x128xf32>
    %169 = arith.mulf %167, %168 : vector<2x128xf32>
    %170 = arith.mulf %169, %169 : vector<2x128xf32>
    %cst_59 = arith.constant dense<0.000000e+00> : vector<2xf32>
    %171 = vector.multi_reduction <add>, %170, %cst_59 [1] : vector<2x128xf32> to vector<2xf32>
    %172 = vector.shape_cast %171 : vector<2xf32> to vector<2x1xf32>
    %cst_60 = arith.constant 6.250000e-02 : f32
    %173 = vector.broadcast %cst_60 : f32 to vector<2x1xf32>
    %174 = arith.mulf %172, %173 : vector<2x1xf32>
    %cst_61 = arith.constant 9.99999974E-6 : f32
    %175 = vector.broadcast %cst_61 : f32 to vector<2x1xf32>
    %176 = arith.addf %174, %175 : vector<2x1xf32>
    %177 = math.rsqrt %176 : vector<2x1xf32>
    %178 = vector.broadcast %177 : vector<2x1xf32> to vector<2x128xf32>
    %179 = arith.mulf %169, %178 : vector<2x128xf32>
    %180 = vector.broadcast %159 : vector<1x128xf32> to vector<2x128xf32>
    %181 = arith.mulf %179, %180 : vector<2x128xf32>
    %182 = vector.broadcast %160 : vector<1x128xf32> to vector<2x128xf32>
    %183 = arith.addf %181, %182 : vector<2x128xf32>
    %184 = arith.truncf %88 : vector<2x128xf32> to vector<2x128xbf16>
    %c2_62 = arith.constant 2 : index
    %c0_63 = arith.constant 0 : index
    %c0_64 = arith.constant 0 : index
    %185 = vector.load %arg3[%c2_62, %c0_63, %c0_64] : memref<4x128x128xbf16, #tpu.memory_space<vmem>>, vector<1x128x128xbf16>
    %186 = vector.shape_cast %185 : vector<1x128x128xbf16> to vector<128x128xbf16>
    %cst_65 = arith.constant dense<0.000000e+00> : vector<2x128xf32>
    %187 = tpu.matmul %184, %186, %cst_65 {dimension_numbers = #tpu.dot_dimension_numbers<[1], [0], [0], [1], [0, 0, 1, 1], [], []>} : vector<2x128xbf16>, vector<128x128xbf16>, vector<2x128xf32> -> vector<2x128xf32>
    %188 = arith.truncf %183 : vector<2x128xf32> to vector<2x128xbf16>
    %c3_66 = arith.constant 3 : index
    %c0_67 = arith.constant 0 : index
    %c0_68 = arith.constant 0 : index
    %189 = vector.load %arg3[%c3_66, %c0_67, %c0_68] : memref<4x128x128xbf16, #tpu.memory_space<vmem>>, vector<1x128x128xbf16>
    %190 = vector.shape_cast %189 : vector<1x128x128xbf16> to vector<128x128xbf16>
    %cst_69 = arith.constant dense<0.000000e+00> : vector<2x128xf32>
    %191 = tpu.matmul %188, %190, %cst_69 {dimension_numbers = #tpu.dot_dimension_numbers<[1], [0], [0], [1], [0, 0, 1, 1], [], []>} : vector<2x128xbf16>, vector<128x128xbf16>, vector<2x128xf32> -> vector<2x128xf32>
    %192 = arith.addf %187, %191 : vector<2x128xf32>
    %c19 = arith.constant 19 : index
    %c0_70 = arith.constant 0 : index
    %193 = vector.load %arg2[%c19, %c0_70] : memref<32x128xf32, #tpu.memory_space<vmem>>, vector<1x128xf32>
    %194 = vector.broadcast %193 : vector<1x128xf32> to vector<2x128xf32>
    %195 = arith.addf %192, %194 : vector<2x128xf32>
    %cst_71 = arith.constant 0.000000e+00 : f32
    %196 = vector.broadcast %cst_71 : f32 to vector<2x128xf32>
    %197 = arith.maximumf %195, %196 : vector<2x128xf32>
    %c20 = arith.constant 20 : index
    %c0_72 = arith.constant 0 : index
    %198 = vector.load %arg2[%c20, %c0_72] : memref<32x128xf32, #tpu.memory_space<vmem>>, vector<1x128xf32>
    %c21 = arith.constant 21 : index
    %c0_73 = arith.constant 0 : index
    %199 = vector.load %arg2[%c21, %c0_73] : memref<32x128xf32, #tpu.memory_space<vmem>>, vector<1x128xf32>
    %c26 = arith.constant 26 : index
    %c0_74 = arith.constant 0 : index
    %200 = vector.load %arg2[%c26, %c0_74] : memref<32x128xf32, #tpu.memory_space<vmem>>, vector<1x128xf32>
    %cst_75 = arith.constant dense<0.000000e+00> : vector<2xf32>
    %201 = vector.multi_reduction <add>, %197, %cst_75 [1] : vector<2x128xf32> to vector<2xf32>
    %202 = vector.shape_cast %201 : vector<2xf32> to vector<2x1xf32>
    %cst_76 = arith.constant 3.125000e-02 : f32
    %203 = vector.broadcast %cst_76 : f32 to vector<2x1xf32>
    %204 = arith.mulf %202, %203 : vector<2x1xf32>
    %205 = vector.broadcast %204 : vector<2x1xf32> to vector<2x128xf32>
    %206 = arith.subf %197, %205 : vector<2x128xf32>
    %207 = vector.broadcast %200 : vector<1x128xf32> to vector<2x128xf32>
    %208 = arith.mulf %206, %207 : vector<2x128xf32>
    %209 = arith.mulf %208, %208 : vector<2x128xf32>
    %cst_77 = arith.constant dense<0.000000e+00> : vector<2xf32>
    %210 = vector.multi_reduction <add>, %209, %cst_77 [1] : vector<2x128xf32> to vector<2xf32>
    %211 = vector.shape_cast %210 : vector<2xf32> to vector<2x1xf32>
    %cst_78 = arith.constant 3.125000e-02 : f32
    %212 = vector.broadcast %cst_78 : f32 to vector<2x1xf32>
    %213 = arith.mulf %211, %212 : vector<2x1xf32>
    %cst_79 = arith.constant 9.99999974E-6 : f32
    %214 = vector.broadcast %cst_79 : f32 to vector<2x1xf32>
    %215 = arith.addf %213, %214 : vector<2x1xf32>
    %216 = math.rsqrt %215 : vector<2x1xf32>
    %217 = vector.broadcast %216 : vector<2x1xf32> to vector<2x128xf32>
    %218 = arith.mulf %208, %217 : vector<2x128xf32>
    %219 = vector.broadcast %198 : vector<1x128xf32> to vector<2x128xf32>
    %220 = arith.mulf %218, %219 : vector<2x128xf32>
    %221 = vector.broadcast %199 : vector<1x128xf32> to vector<2x128xf32>
    %222 = arith.addf %220, %221 : vector<2x128xf32>
    %c22 = arith.constant 22 : index
    %c0_80 = arith.constant 0 : index
    %223 = vector.load %arg2[%c22, %c0_80] : memref<32x128xf32, #tpu.memory_space<vmem>>, vector<1x128xf32>
    %224 = vector.shape_cast %223 : vector<1x128xf32> to vector<1x128xf32>
    %225 = vector.broadcast %224 : vector<1x128xf32> to vector<8x128xf32>
    %cst_81 = arith.constant dense<0.000000e+00> : vector<8x2xf32>
    %226 = tpu.matmul %225, %222, %cst_81 {dimension_numbers = #tpu.dot_dimension_numbers<[1], [1], [0], [0], [0, 0, 1, 0], [], []>} : vector<8x128xf32>, vector<2x128xf32>, vector<8x2xf32> -> vector<8x2xf32>
    %c23 = arith.constant 23 : index
    %c0_82 = arith.constant 0 : index
    %227 = vector.load %arg2[%c23, %c0_82] : memref<32x128xf32, #tpu.memory_space<vmem>>, vector<1x1xf32>
    %228 = vector.broadcast %227 : vector<1x1xf32> to vector<8x2xf32>
    %229 = arith.addf %226, %228 : vector<8x2xf32>
    %c0_83 = arith.constant 0 : index
    %c0_84 = arith.constant 0 : index
    %230 = vector.load %arg4[%c0_83, %c0_84] : memref<8x2xf32, #tpu.memory_space<vmem>>, vector<8x2xf32>
    tpu.vector_store %arg4[%c0_83, %c0_84], %229 {strides = array<i32>} : memref<8x2xf32, #tpu.memory_space<vmem>>, vector<8x2xf32>,
    return
  }
  func.func @transform_0(%arg0: i32) -> (i32, i32, i32) {
    %c0_i32 = arith.constant 0 : i32
    %c0_i32_0 = arith.constant 0 : i32
    %c0_i32_1 = arith.constant 0 : i32
    return %arg0, %c0_i32, %c0_i32_0 : i32, i32, i32
  }
  func.func @transform_1(%arg0: i32) -> (i32, i32) {
    %c0_i32 = arith.constant 0 : i32
    %c0_i32_0 = arith.constant 0 : i32
    %c0_i32_1 = arith.constant 0 : i32
    return %c0_i32, %c0_i32_0 : i32, i32
  }
  func.func @transform_2(%arg0: i32) -> (i32, i32, i32) {
    %c0_i32 = arith.constant 0 : i32
    %c0_i32_0 = arith.constant 0 : i32
    %c0_i32_1 = arith.constant 0 : i32
    %c0_i32_2 = arith.constant 0 : i32
    return %c0_i32, %c0_i32_0, %c0_i32_1 : i32, i32, i32
  }
  func.func @transform_3(%arg0: i32) -> (i32, i32) {
    %c0_i32 = arith.constant 0 : i32
    %c0_i32_0 = arith.constant 0 : i32
    return %arg0, %c0_i32 : i32, i32
  }
}

</mosaic_0001>

<bundles_post_ra>
// kernel: tpu_custom_call.1
= control target key start
LH: loop header
LB: loop body
LE: loop exit
PB: predicated region body
PF: predicated region fallthrough
CT: control target
= control target key end

     0   :  { %8 = vsyncpa [#allocation3], 0  ;;  %s1060_s15 = smov [#allocation2]   ;;  %s1061_s17 = smov 64   ;;  %s1296_s0 = inlined_call_operand.vmem [shape: f32[2,16,8], index: 0, kind: input, shape index: {}]   ;;  %s1297_s1 = inlined_call_operand.vmem [shape: f32[32,128], index: 1, kind: input, shape index: {}]   ;;  %s1298_s2 = inlined_call_operand.hbm [shape: bf16[4,128,128], index: 2, kind: input, shape index: {}]   ;;  %s1299_s3 = inlined_call_operand.vmem [shape: f32[8,2], index: 3, kind: output, shape index: {}]  }
   0x1   :  { %s17_s14 = sshll.u32 %s1298_s2, 4  ;;  %s19_s16 = sshll.u32 %s1060_s15, 4  ;;  %s18_s14 = int_to_ptr.hbm [resolvable:$true] %s17_s14  ;;  %s20_s16 = int_to_ptr.vmem [resolvable:$true] %s19_s16 }
   0x2   :  { %s1062_s18 = smov 4  }
   0x3   :  { %25 = dma.hbm_to_vmem [thread:$0]  %s18_s14, 4096, %s20_s16, [#allocation3], %s1061_s17, %s1061_s17, %s1062_s18  }
   0x4   :  { %1058 = dma.done.wait [#allocation3], 4096  }
   0x5   :  { %1059 = vsyncadd [#allocation3], 4294963200  ;;  %v1063_v0 = vmov 1   ;;  %v1064_v1 = vmov 0   ;;  %v1094_v2 = vld [vmem:[%s1296_s0] sm:$0xff]  ;;  %v33_v3 = vld [vmem:[%s1296_s0 + $0x18] sm:$0xff] }
   0x6   :  { %977 = vset.pattern.permute.xlu1 %v1063_v0  ;;  %976 = vset.pattern.permute.xlu0 %v1064_v1  ;;  %v1104_v4 = vld [vmem:[%s1296_s0 + $0x10] sm:$0xff]  ;;  %v31_v5 = vld [vmem:[%s1296_s0 + $0x8] sm:$0xff]  ;;  %v1065_v6 = vmov 2   ;;  %v1066_v7 = vmov 3   ;;  %v1067_v8 = vmov 4   ;;  %vm351_vm0 = vcmask 1041409  }
   0x7   :  { %978 = vset.pattern.permute.xlu2 %v1064_v1  ;;  %50 = vperm.xlu1 %977, %v1094_v2   ;;  %v991_v10 = vld [vmem:[%s1297_s1 + $0x1] ss:$0 sm:$0xff]  ;;  %v992_v11 = vld [vmem:[%s1297_s1] ss:$0 sm:$0xff]  ;;  %v994_v16 = vld [vmem:[%s1297_s1 + $0x2] ss:$0 sm:$0xff] }
   0x8   :  { %37 = vperm.xlu0 %976, %v1094_v2   ;;  %341 = vperm.xlu2 %978, %v33_v3   ;;  %v990_v28 = vld [vmem:[%s1297_s1 + $0x8] ss:$0 sm:$0xff]  ;;  %v995_v31 = vld [vmem:[%s1297_s1 + $0x9] ss:$0 sm:$0xff]  ;;  %v996_v34 = vld [vmem:[%s1297_s1 + $0xa] ss:$0 sm:$0xff] }
   0x9   :  { %v997_v38 = vld [vmem:[%s1297_s1 + $0xb] ss:$0 sm:$0xff]  ;;  %v993_v43 = vld [vmem:[%s1297_s1 + $0xd] ss:$0 sm:$0xff]  ;;  %v998_v55 = vld [vmem:[%s1297_s1 + $0xc] ss:$0 sm:$0xff] }
   0xa   :  { %vm431_vm1 = vcmask 1041408   ;;  %vm275_vm11 = vcmask 23568  }
   0xf   :  { %54 = vperm.xlu1 %977, %v1104_v4  }
  0x10   :  { %42 = vperm.xlu0 %976, %v1104_v4   ;;  %336 = vperm.xlu2 %978, %v31_v5  }
  0x17   :  { %357 = vperm.xlu1 %977, %v31_v5  }
  0x18   :  { %979 = vset.pattern.permute.xlu0 %v1063_v0  ;;  %980 = vset.pattern.permute.xlu2 %v1065_v6 }
  0x19   :  { %361 = vperm.xlu0 %979, %v33_v3   ;;  %379 = vperm.xlu2 %980, %v33_v3  }
  0x1f   :  { %981 = vset.pattern.permute.xlu1 %v1065_v6 }
  0x20   :  { %375 = vperm.xlu1 %981, %v31_v5  }
  0x21   :  { %983 = vset.pattern.permute.xlu0 %v1066_v7  ;;  %982 = vset.pattern.permute.xlu2 %v1066_v7 }
  0x22   :  { %393 = vperm.xlu0 %983, %v31_v5   ;;  %397 = vperm.xlu2 %982, %v33_v3  }
  0x28   :  { %984 = vset.pattern.permute.xlu1 %v1067_v8 }
  0x29   :  { %415 = vperm.xlu1 %984, %v33_v3  }
  0x2a   :  { %986 = vset.pattern.permute.xlu0 %v1065_v6  ;;  %985 = vset.pattern.permute.xlu2 %v1067_v8 }
  0x2b   :  { %411 = vperm.xlu2 %985, %v31_v5  }
  0x31   :  { %987 = vset.pattern.permute.xlu1 %v1065_v6 }
  0x33   :  { %988 = vset.pattern.permute.xlu2 %v1065_v6 }
  0x62   :  { %v342_v9 = vpop.permute.xlu2 %341 }
  0x63   :  { %v346_v33 = vmul.f32 %v990_v28, %v342_v9 }
  0x65   :  { %v350_v36 = vrot.slane %v346_v33, 7  ;;  %v949_v33 = vld [vmem:[#allocation2 + $0x78] sm:$0xff] }
  0x66   :  { %528 = vmatpush.bf16.msra.mxu1 %v949_v33 }
  0x6a   :  { %v337_v19 = vpop.permute.xlu2 %336 }
  0x6b   :  { %v345_v37 = vmul.f32 %v990_v28, %v337_v19  ;;  %v939_v28 = vld [vmem:[#allocation2 + $0x28] sm:$0xff] }
  0x6d   :  { %v352_v44 = vsel %vm351_vm0, %v350_v36, %v345_v37 }
  0x6e   :  { %v354_v51 = vadd.f32 %v993_v43, %v352_v44  ;;  %v947_v43 = vld [vmem:[#allocation2 + $0x68] sm:$0xff] }
  0x73   :  { %v380_v27 = vpop.permute.xlu2 %379 }
  0x74   :  { %v384_v40 = vmul.f32 %v996_v34, %v380_v27  ;;  %v940_v27 = vld [vmem:[#allocation2 + $0x30] sm:$0xff] }
  0x76   :  { %v387_v49 = vrot.slane %v384_v40, 7 }
  0x79   :  { %v51_v12 = vpop.permute.xlu1 %50 }
  0x7a   :  { %v38_v13 = vpop.permute.xlu0 %37  ;;  %v58_v14 = vmul.f32 %v991_v10, %v51_v12 }
  0x7b   :  { %v46_v15 = vmul.f32 %v992_v11, %v38_v13 }
  0x7c   :  { %v398_v39 = vpop.permute.xlu2 %397 }
  0x7d   :  { %v60_v17 = vadd.f32 %v58_v14, %v46_v15  ;;  %v402_v46 = vmul.f32 %v997_v38, %v398_v39 }
  0x7f   :  { %v64_v18 = vadd.f32 %v994_v16, %v60_v17  ;;  %v405_v52 = vrot.slane %v402_v46, 7  ;;  %v946_v46 = vld [vmem:[#allocation2 + $0x60] sm:$0xff] }
  0x81   :  { %v66_v20 = vmax.f32 %v64_v18, 0.0  ;;  %v55_v21 = vpop.permute.xlu1 %54 }
  0x82   :  { %v43_v22 = vpop.permute.xlu0 %42  ;;  %v59_v23 = vmul.f32 %v991_v10, %v55_v21  ;;  %v1149_v10 = vld [vmem:[%s1297_s1 + $0x18] ss:$0 sm:$0xff] }
  0x83   :  { %v47_v24 = vmul.f32 %v992_v11, %v43_v22  ;;  %71 = vadd.xlane.f32.xlu1 %v66_v20 }
  0x85   :  { %v61_v25 = vadd.f32 %v59_v23, %v47_v24  ;;  %v412_v57 = vpop.permute.xlu2 %411 }
  0x86   :  { %v419_v62 = vmul.f32 %v998_v55, %v412_v57  ;;  %v943_v57 = vld [vmem:[#allocation2 + $0x48] sm:$0xff] }
  0x87   :  { %v65_v26 = vadd.f32 %v994_v16, %v61_v25 }
  0x89   :  { %v67_v29 = vmax.f32 %v65_v26, 0.0  ;;  %v358_v30 = vpop.permute.xlu1 %357  ;;  %v941_v26 = vld [vmem:[#allocation2 + $0x38] sm:$0xff] }
  0x8a   :  { %v365_v45 = vmul.f32 %v995_v31, %v358_v30  ;;  %187 = vmatpush.bf16.msra.mxu0 %v941_v26  ;;  %v937_v30 = vld [vmem:[#allocation2 + $0x18] sm:$0xff] }
  0x8b   :  { %73 = vadd.xlane.f32.xlu2 %v67_v29  ;;  %v362_v32 = vpop.permute.xlu0 %361 }
  0x8c   :  { %v366_v35 = vmul.f32 %v995_v31, %v362_v32  ;;  %v936_v31 = vld [vmem:[#allocation2 + $0x10] sm:$0xff]  ;;  %v935_v32 = vld [vmem:[#allocation2 + $0x8] sm:$0xff] }
  0x8e   :  { %v369_v41 = vrot.slane %v366_v35, 7  ;;  %188 = vmatpush.bf16.msra.mxu0 %v940_v27  ;;  %v934_v35 = vld [vmem:[#allocation2] sm:$0xff] }
  0x90   :  { %v370_v50 = vsel %vm351_vm0, %v369_v41, %v365_v45 }
  0x91   :  { %v372_v56 = vadd.f32 %v370_v50, %v354_v51  ;;  %v945_v50 = vld [vmem:[#allocation2 + $0x58] sm:$0xff] }
  0x92   :  { %v376_v42 = vpop.permute.xlu1 %375  ;;  %189 = vmatpush.bf16.msra.mxu0 %v939_v28 }
  0x93   :  { %v383_v47 = vmul.f32 %v996_v34, %v376_v42 }
  0x94   :  { %v394_v48 = vpop.permute.xlu0 %393 }
  0x95   :  { %v388_v53 = vsel %vm351_vm0, %v387_v49, %v383_v47  ;;  %v401_v54 = vmul.f32 %v997_v38, %v394_v48  ;;  %v948_v38 = vld [vmem:[#allocation2 + $0x70] sm:$0xff] }
  0x96   :  { %v390_v58 = vadd.f32 %v388_v53, %v372_v56  ;;  %529 = vmatpush.bf16.msra.mxu1 %v948_v38 }
  0x97   :  { %v406_v60 = vsel %vm351_vm0, %v405_v52, %v401_v54  ;;  %v944_v54 = vld [vmem:[#allocation2 + $0x50] sm:$0xff] }
  0x98   :  { %v408_v0 = vadd.f32 %v406_v60, %v390_v58  ;;  %v1001_v60 = vld [vmem:[%s1297_s1 + $0x3] ss:$0 sm:$0xff] }
  0x9a   :  { %530 = vmatpush.bf16.msra.mxu1 %v947_v43 }
  0x9b   :  { %v416_v59 = vpop.permute.xlu1 %415 }
  0x9c   :  { %v420_v61 = vmul.f32 %v998_v55, %v416_v59 }
  0x9e   :  { %v423_v63 = vrot.slane %v420_v61, 7  ;;  %531 = vmatpush.bf16.msra.mxu1 %v946_v46 }
  0xa0   :  { %v424_v1 = vsel %vm351_vm0, %v423_v63, %v419_v62  ;;  %v942_v62 = vld [vmem:[#allocation2 + $0x40] sm:$0xff] }
  0xa1   :  { %v426_v3 = vadd.f32 %v424_v1, %v408_v0 }
  0xa2   :  { %532 = vmatpush.bf16.msra.mxu1 %v945_v50 }
  0xa3   :  { %v427_v5 = vmax.f32 %v426_v3, 0.0  ;;  %v1002_v3 = vld [vmem:[%s1297_s1 + $0x4] ss:$0 sm:$0xff] }
  0xa5   :  { %v432_v6 = vsel %vm431_vm1, %v427_v5, 0.0 }
  0xa6   :  { %433 = vadd.xlane.f32.xlu0 %v432_v6  ;;  %533 = vmatpush.bf16.msra.mxu1 %v944_v54 }
  0xaa   :  { %534 = vmatpush.bf16.msra.mxu1 %v943_v57 }
  0xae   :  { %535 = vmatpush.bf16.msra.mxu1 %v942_v62 }
  0xf6   :  { %v72_v7 = vpop.xlane.xlu1 %71 }
  0xf7   :  { %v75_v9 = vmul.f32 0.015625, %v72_v7 }
  0xf9   :  { %v77_v11 = vsub.f32 %v66_v20, %v75_v9  ;;  %v1164_v20 = vld [vmem:[%s1297_s1 + $0x19] ss:$0 sm:$0xff] }
  0xfb   :  { %v1152_v12 = vmul.f32 %v1149_v10, %v77_v11 }
  0xfd   :  { %v82_v13 = vmul.f32 %v1152_v12, %v1152_v12 }
  0xfe   :  { %v74_v14 = vpop.xlane.xlu2 %73 }
  0xff   :  { %v76_v15 = vmul.f32 0.015625, %v74_v14  ;;  %84 = vadd.xlane.f32.xlu2 %v82_v13 }
 0x101   :  { %v78_v16 = vsub.f32 %v67_v29, %v76_v15  ;;  %v938_v29 = vld [vmem:[#allocation2 + $0x20] sm:$0xff] }
 0x102   :  { %190 = vmatpush.bf16.msra.mxu0 %v938_v29  ;;  %v1005_v29 = vld [vmem:[%s1297_s1 + $0x5] ss:$0 sm:$0xff] }
 0x103   :  { %v1157_v17 = vmul.f32 %v1149_v10, %v78_v16 }
 0x105   :  { %v83_v18 = vmul.f32 %v1157_v17, %v1157_v17 }
 0x106   :  { %191 = vmatpush.bf16.msra.mxu0 %v937_v30 }
 0x107   :  { %86 = vadd.xlane.f32.xlu1 %v83_v18 }
 0x10a   :  { %192 = vmatpush.bf16.msra.mxu0 %v936_v31 }
 0x10e   :  { %193 = vmatpush.bf16.msra.mxu0 %v935_v32 }
 0x112   :  { %194 = vmatpush.bf16.msra.mxu0 %v934_v35 }
 0x119   :  { %v434_v19 = vpop.xlane.xlu0 %433 }
 0x11a   :  { %v435_v21 = vmul.f32 0.0625, %v434_v19 }
 0x11c   :  { %v436_v22 = vsub.f32 %v427_v5, %v435_v21  ;;  %v1003_v21 = vld [vmem:[%s1297_s1 + $0xe] ss:$0 sm:$0xff] }
 0x11e   :  { %v1167_v23 = vmul.f32 %v1164_v20, %v436_v22 }
 0x120   :  { %v439_v24 = vmul.f32 %v1167_v23, %v1167_v23 }
 0x122   :  { %v440_v25 = vsel %vm431_vm1, %v439_v24, 0.0 }
 0x123   :  { %441 = vadd.xlane.f32.xlu2 %v440_v25  ;;  %v1004_v25 = vld [vmem:[%s1297_s1 + $0xf] ss:$0 sm:$0xff] }
 0x172   :  { %v85_v34 = vpop.xlane.xlu2 %84 }
 0x173   :  { %v88_v36 = vmul.f32 0.015625, %v85_v34 }
 0x175   :  { %v90_v37 = vadd.f32 1e-05, %v88_v36 }
 0x177   :  { %1016 = vrsqrt.f32 %v90_v37  ;;  %vm98_vm3 = vweird.f32 %v90_v37 }
 0x17a   :  { %v87_v39 = vpop.xlane.xlu1 %86 }
 0x17b   :  { %v89_v40 = vmul.f32 0.015625, %v87_v39 }
 0x17d   :  { %v1017_v41 = vpop.eup %1016  ;;  %v91_v42 = vadd.f32 1e-05, %v89_v40  ;;  %v1006_v40 = vld [vmem:[%s1297_s1 + $0x10] ss:$0 sm:$0xff] }
 0x17e   :  { %v93_v44 = vmul.f32 %v1017_v41, %v90_v37  ;;  %vm99_vm2 = vweird.f32 %v1017_v41 }
 0x17f   :  { %1018 = vrsqrt.f32 %v91_v42  ;;  %vm100_vm4 = vmor %vm98_vm3, %vm99_vm2  ;;  %vm108_vm6 = vweird.f32 %v91_v42 }
 0x180   :  { %v94_v45 = vmul.f32 %v1017_v41, %v93_v44 }
 0x182   :  { %v95_v47 = vmul.f32 0.5, %v94_v45 }
 0x184   :  { %v96_v48 = vsub.f32 1.5, %v95_v47 }
 0x185   :  { %v1019_v49 = vpop.eup %1018 }
 0x186   :  { %v97_v51 = vmul.f32 %v1017_v41, %v96_v48  ;;  %v103_v52 = vmul.f32 %v1019_v49, %v91_v42  ;;  %vm109_vm5 = vweird.f32 %v1019_v49 }
 0x187   :  { %vm110_vm7 = vmor %vm108_vm6, %vm109_vm5 }
 0x188   :  { %v104_v53 = vmul.f32 %v1019_v49, %v103_v52  ;;  %v101_v56 = vsel %vm100_vm4, %v1017_v41, %v97_v51 }
 0x189   :  { %v112_v59 = vmul.f32 %v101_v56, %v1152_v12 }
 0x18a   :  { %v105_v55 = vmul.f32 0.5, %v104_v53 }
 0x18b   :  { %v115_v1 = vmul.f32 %v1001_v60, %v112_v59 }
 0x18c   :  { %v106_v58 = vsub.f32 1.5, %v105_v55 }
 0x18d   :  { %v118_v6 = vadd.f32 %v1002_v3, %v115_v1 }
 0x18e   :  { %v107_v61 = vmul.f32 %v1019_v49, %v106_v58 }
 0x190   :  { %v111_v63 = vsel %vm110_vm7, %v1019_v49, %v107_v61  ;;  %v276_v49 = vsel %vm275_vm11, %v1094_v2, 0.0 }
 0x191   :  { %v113_v0 = vmul.f32 %v111_v63, %v1157_v17  ;;  %v277_v51 = vrot.slane %v276_v49, 4 }
 0x193   :  { %v116_v5 = vmul.f32 %v1001_v60, %v113_v0  ;;  %v278_v55 = vadd.f32 %v277_v51, %v276_v49 }
 0x195   :  { %v119_v7 = vadd.f32 %v1002_v3, %v116_v5  ;;  %v279_v59 = vrot.slane %v278_v55, 2 }
 0x196   :  { %v442_v9 = vpop.xlane.xlu2 %441 }
 0x197   :  { %v120_v11 = vpack.c.bf16 %v119_v7, %v118_v6  ;;  %v443_v12 = vmul.f32 0.0625, %v442_v9  ;;  %v280_v62 = vadd.f32 %v279_v59, %v278_v55 }
 0x199   :  { %195 = vmatmul.bf16.vlgmr.msra.gmra.mxu0 %v120_v11  ;;  %v444_v13 = vadd.f32 1e-05, %v443_v12  ;;  %v281_v0 = vrot.slane %v280_v62, 1  ;;  %v965_v12 = vld [vmem:[#allocation2 + $0xf8] sm:$0xff] }
 0x19a   :  { %656 = vmatpush.bf16.msra.mxu2 %v965_v12 }
 0x19b   :  { %1020 = vrsqrt.f32 %v444_v13  ;;  %vm451_vm9 = vweird.f32 %v444_v13  ;;  %v282_v1 = vadd.f32 %v281_v0, %v280_v62 }
 0x19d   :  { %v290_v3 = vmax.f32 %v282_v1, 1.0 }
 0x1a1   :  { %v1021_v14 = vpop.eup %1020 }
 0x1a2   :  { %v446_v15 = vmul.f32 %v1021_v14, %v444_v13  ;;  %vm452_vm8 = vweird.f32 %v1021_v14  ;;  %v957_v13 = vld [vmem:[#allocation2 + $0xb8] sm:$0xff] }
 0x1a3   :  { %vm453_vm10 = vmor %vm451_vm9, %vm452_vm8  ;;  %724 = vmatpush.bf16.msra.mxu3 %v957_v13 }
 0x1a4   :  { %v447_v16 = vmul.f32 %v1021_v14, %v446_v15 }
 0x1a6   :  { %v448_v18 = vmul.f32 0.5, %v447_v16  ;;  %v964_v16 = vld [vmem:[#allocation2 + $0xf0] sm:$0xff] }
 0x1a7   :  { %657 = vmatpush.bf16.msra.mxu2 %v964_v16 }
 0x1a8   :  { %v449_v17 = vsub.f32 1.5, %v448_v18  ;;  %v956_v18 = vld [vmem:[#allocation2 + $0xb0] sm:$0xff] }
 0x1a9   :  { %725 = vmatpush.bf16.msra.mxu3 %v956_v18 }
 0x1aa   :  { %v450_v19 = vmul.f32 %v1021_v14, %v449_v17 }
 0x1ac   :  { %v454_v22 = vsel %vm453_vm10, %v1021_v14, %v450_v19  ;;  %v955_v19 = vld [vmem:[#allocation2 + $0xa8] sm:$0xff] }
 0x1ad   :  { %v455_v24 = vmul.f32 %v454_v22, %v1167_v23  ;;  %v283_v23 = vsel %vm275_vm11, %v1104_v4, 0.0  ;;  %726 = vmatpush.bf16.msra.mxu3 %v955_v19  ;;  %v954_v22 = vld [vmem:[#allocation2 + $0xa0] sm:$0xff] }
 0x1ae   :  { %v284_v35 = vrot.slane %v283_v23, 4 }
 0x1af   :  { %v457_v26 = vmul.f32 %v1003_v21, %v455_v24  ;;  %v962_v21 = vld [vmem:[#allocation2 + $0xe0] sm:$0xff] }
 0x1b0   :  { %v285_v37 = vadd.f32 %v284_v35, %v283_v23  ;;  %v959_v35 = vld [vmem:[#allocation2 + $0xc8] sm:$0xff] }
 0x1b1   :  { %v459_v27 = vadd.f32 %v1004_v25, %v457_v26  ;;  %727 = vmatpush.bf16.msra.mxu3 %v954_v22 }
 0x1b2   :  { %v286_v38 = vrot.slane %v285_v37, 2 }
 0x1b3   :  { %v460_v28 = vpack.c.bf16 %v459_v27, %v459_v27  ;;  %v961_v27 = vld [vmem:[#allocation2 + $0xd8] sm:$0xff] }
 0x1b4   :  { %v287_v39 = vadd.f32 %v286_v38, %v285_v37 }
 0x1b5   :  { %536 = vmatmul.bf16.vlgmr.msra.gmra.mxu1 %v460_v28 }
 0x1b6   :  { %v288_v41 = vrot.slane %v287_v39, 1 }
 0x1b8   :  { %v289_v44 = vadd.f32 %v288_v41, %v287_v39 }
 0x1ba   :  { %v291_v47 = vmax.f32 %v289_v44, 1.0 }
 0x216   :  { %v196_v30 = vpop.f32.mrf.mxu0 }
 0x217   :  { %v197_v31 = vadd.f32 %v1005_v29, %v196_v30 }
 0x219   :  { %v201_v32 = vmax.f32 %v197_v31, 0.0  ;;  %v960_v31 = vld [vmem:[#allocation2 + $0xd0] sm:$0xff] }
 0x21b   :  { %205 = vadd.xlane.f32.xlu0 %v201_v32 }
 0x21e   :  { %v198_v33 = vpop.f32.mrf.mxu0 }
 0x21f   :  { %v199_v34 = vadd.f32 %v1005_v29, %v198_v33  ;;  %v953_v29 = vld [vmem:[#allocation2 + $0x98] sm:$0xff] }
 0x220   :  { %728 = vmatpush.bf16.msra.mxu3 %v953_v29 }
 0x221   :  { %v202_v36 = vmax.f32 %v199_v34, 0.0 }
 0x223   :  { %207 = vadd.xlane.f32.xlu1 %v202_v36 }
 0x232   :  { %v537_v42 = vpop.f32.mrf.mxu1 }
 0x233   :  { %v538_v43 = vadd.f32 %v1006_v40, %v537_v42  ;;  %v958_v40 = vld [vmem:[#allocation2 + $0xc0] sm:$0xff] }
 0x234   :  { %v950_v42 = vld [vmem:[#allocation2 + $0x80] sm:$0xff] }
 0x235   :  { %v541_v45 = vmax.f32 %v538_v43, 0.0 }
 0x237   :  { %v544_v46 = vsel %vm431_vm1, %v541_v45, 0.0 }
 0x238   :  { %545 = vadd.xlane.f32.xlu2 %v544_v46 }
 0x23a   :  { %v539_v48 = vpop.f32.mrf.mxu1 }
 0x23b   :  { %v1007_v48 = vld [vmem:[%s1297_s1 + $0x6] ss:$0 sm:$0xff] }
 0x23c   :  { %299 = vperm.xlu1 %987, %v291_v47  }
 0x28e   :  { %v206_v50 = vpop.xlane.xlu0 %205 }
 0x28f   :  { %v209_v52 = vmul.f32 0.015625, %v206_v50 }
 0x291   :  { %v211_v53 = vsub.f32 %v201_v32, %v209_v52  ;;  %v952_v32 = vld [vmem:[#allocation2 + $0x90] sm:$0xff] }
 0x292   :  { %729 = vmatpush.bf16.msra.mxu3 %v952_v32 }
 0x293   :  { %v1199_v54 = vmul.f32 %v1149_v10, %v211_v53 }
 0x295   :  { %v215_v56 = vmul.f32 %v1199_v54, %v1199_v54 }
 0x296   :  { %v208_v57 = vpop.xlane.xlu1 %207 }
 0x297   :  { %v210_v58 = vmul.f32 0.015625, %v208_v57  ;;  %217 = vadd.xlane.f32.xlu0 %v215_v56  ;;  %v1008_v57 = vld [vmem:[%s1297_s1 + $0x7] ss:$0 sm:$0xff] }
 0x299   :  { %v212_v60 = vsub.f32 %v202_v36, %v210_v58  ;;  %v951_v36 = vld [vmem:[#allocation2 + $0x88] sm:$0xff] }
 0x29a   :  { %730 = vmatpush.bf16.msra.mxu3 %v951_v36 }
 0x29b   :  { %v1204_v61 = vmul.f32 %v1149_v10, %v212_v60 }
 0x29d   :  { %v216_v63 = vmul.f32 %v1204_v61, %v1204_v61 }
 0x29e   :  { %731 = vmatpush.bf16.msra.mxu3 %v950_v42 }
 0x29f   :  { %219 = vadd.xlane.f32.xlu1 %v216_v63 }
 0x2ab   :  { %294 = vperm.xlu0 %986, %v290_v3   ;;  %v546_v5 = vpop.xlane.xlu2 %545 }
 0x2ac   :  { %v547_v6 = vmul.f32 0.0625, %v546_v5 }
 0x2ae   :  { %v548_v7 = vsub.f32 %v541_v45, %v547_v6  ;;  %v1217_v14 = vpop.permute.xlu1 %299 }
 0x2af   :  { %vm322_vm4 = vweird.f32 %v1217_v14  ;;  %v328_v12 = vand.u32 2147483648, %v1217_v14  ;;  %v326_v16 = vand.u32 2147483647, %v1217_v14 }
 0x2b0   :  { %v1209_v9 = vmul.f32 %v1164_v20, %v548_v7 }
 0x2b1   :  { %v329_v22 = vor.u32 1.1754944e-38, %v328_v12  ;;  %vm327_vm9 = vcmp.eq.f32.partialorder %v326_v16, 8.507059e+37 }
 0x2b2   :  { %v550_v11 = vmul.f32 %v1209_v9, %v1209_v9 }
 0x2b3   :  { %989 = vset.pattern.permute.xlu0 %v1067_v8  ;;  %v963_v8 = vld [vmem:[#allocation2 + $0xe8] sm:$0xff] }
 0x2b4   :  { %v551_v10 = vsel %vm431_vm1, %v550_v11, 0.0  ;;  %658 = vmatpush.bf16.msra.mxu2 %v963_v8  ;;  %v1013_v8 = vld [vmem:[%s1297_s1 + $0x14] ss:$0 sm:$0xff] }
 0x2b5   :  { %552 = vadd.xlane.f32.xlu2 %v551_v10 }
 0x2b8   :  { %258 = vperm.xlu1 %987, %v1104_v4   ;;  %659 = vmatpush.bf16.msra.mxu2 %v962_v21 }
 0x2bc   :  { %660 = vmatpush.bf16.msra.mxu2 %v961_v27 }
 0x2c0   :  { %661 = vmatpush.bf16.msra.mxu2 %v960_v31 }
 0x2c4   :  { %662 = vmatpush.bf16.msra.mxu2 %v959_v35 }
 0x2c8   :  { %663 = vmatpush.bf16.msra.mxu2 %v958_v40 }
 0x2cd   :  { %254 = vperm.xlu2 %988, %v1094_v2  }
 0x30a   :  { %v218_v15 = vpop.xlane.xlu0 %217 }
 0x30b   :  { %v221_v20 = vmul.f32 0.015625, %v218_v15 }
 0x30d   :  { %v223_v17 = vadd.f32 1e-05, %v221_v20 }
 0x30f   :  { %1022 = vrsqrt.f32 %v223_v17  ;;  %vm231_vm13 = vweird.f32 %v223_v17 }
 0x312   :  { %v220_v4 = vpop.xlane.xlu1 %219 }
 0x313   :  { %v222_v2 = vmul.f32 0.015625, %v220_v4 }
 0x315   :  { %v1023_v24 = vpop.eup %1022  ;;  %v224_v25 = vadd.f32 1e-05, %v222_v2 }
 0x316   :  { %v226_v26 = vmul.f32 %v1023_v24, %v223_v17  ;;  %vm232_vm12 = vweird.f32 %v1023_v24 }
 0x317   :  { %1024 = vrsqrt.f32 %v224_v25  ;;  %vm233_vm14 = vmor %vm231_vm13, %vm232_vm12  ;;  %vm241_vm2 = vweird.f32 %v224_v25 }
 0x318   :  { %v227_v28 = vmul.f32 %v1023_v24, %v226_v26  ;;  %1026 = vrcp.f32 %v1217_v14 }
 0x31a   :  { %v228_v30 = vmul.f32 0.5, %v227_v28 }
 0x31c   :  { %v229_v33 = vsub.f32 1.5, %v228_v30 }
 0x31d   :  { %v1025_v23 = vpop.eup %1024  ;;  %v1220_v38 = vpop.permute.xlu0 %294 }
 0x31e   :  { %v236_v34 = vmul.f32 %v1025_v23, %v224_v25  ;;  %v230_v39 = vmul.f32 %v1023_v24, %v229_v33  ;;  %1028 = vrcp.f32 %v1220_v38  ;;  %vm242_vm15 = vweird.f32 %v1025_v23  ;;  %v1223_v45 = vpop.eup %1026 }
 0x31f   :  { %vm243_vm3 = vmor %vm241_vm2, %vm242_vm15  ;;  %v318_v51 = vmul.f32 %v1223_v45, %v1217_v14  ;;  %vm323_vm5 = vweird.f32 %v1223_v45  ;;  %vm307_vm7 = vweird.f32 %v1220_v38  ;;  %v313_v4 = vand.u32 2147483648, %v1220_v38 }
 0x320   :  { %v237_v37 = vmul.f32 %v1025_v23, %v236_v34  ;;  %v234_v44 = vsel %vm233_vm14, %v1023_v24, %v230_v39  ;;  %vm1246_vm6 = vmor %vm322_vm4, %vm323_vm5  ;;  %v311_v14 = vand.u32 2147483647, %v1220_v38  ;;  %v1009_v39 = vld [vmem:[%s1297_s1 + $0x11] ss:$0 sm:$0xff] }
 0x321   :  { %v245_v49 = vmul.f32 %v234_v44, %v1199_v54  ;;  %v319_v54 = vsub.f32 1.0, %v318_v51  ;;  %v314_v31 = vor.u32 1.1754944e-38, %v313_v4 }
 0x322   :  { %v238_v41 = vmul.f32 0.5, %v237_v37  ;;  %vm312_vm12 = vcmp.eq.f32.partialorder %v311_v14, 8.507059e+37 }
 0x323   :  { %v248_v60 = vmul.f32 %v1007_v48, %v245_v49 }
 0x324   :  { %v239_v43 = vsub.f32 1.5, %v238_v41  ;;  %v1229_v50 = vpop.eup %1028 }
 0x325   :  { %v303_v58 = vmul.f32 %v1229_v50, %v1220_v38  ;;  %v251_v3 = vadd.f32 %v1008_v57, %v248_v60  ;;  %vm308_vm8 = vweird.f32 %v1229_v50 }
 0x326   :  { %v240_v46 = vmul.f32 %v1025_v23, %v239_v43  ;;  %vm1255_vm10 = vmor %vm307_vm7, %vm308_vm8  ;;  %v1010_v43 = vld [vmem:[%s1297_s1 + $0x12] ss:$0 sm:$0xff] }
 0x327   :  { %v304_v1 = vsub.f32 1.0, %v303_v58 }
 0x328   :  { %v244_v47 = vsel %vm243_vm3, %v1025_v23, %v240_v46  ;;  %v553_v52 = vpop.xlane.xlu2 %552 }
 0x329   :  { %v246_v53 = vmul.f32 %v244_v47, %v1204_v61  ;;  %v554_v55 = vmul.f32 0.0625, %v553_v52  ;;  %v320_v61 = vmul.f32 %v1223_v45, %v319_v54  ;;  %v305_v13 = vmul.f32 %v1229_v50, %v304_v1 }
 0x32a   :  { %v259_v63 = vpop.permute.xlu1 %258 }
 0x32b   :  { %v249_v56 = vmul.f32 %v1007_v48, %v246_v53  ;;  %v555_v59 = vadd.f32 1e-05, %v554_v55  ;;  %v321_v20 = vadd.f32 %v1223_v45, %v320_v61  ;;  %v306_v24 = vadd.f32 %v1229_v50, %v305_v13 }
 0x32d   :  { %v252_v62 = vadd.f32 %v1008_v57, %v249_v56  ;;  %1030 = vrsqrt.f32 %v555_v59  ;;  %v325_v29 = vsel %vm1246_vm6, %v1223_v45, %v321_v20  ;;  %v310_v33 = vsel %vm1255_vm10, %v1229_v50, %v306_v24  ;;  %v1015_v24 = vld [vmem:[%s1297_s1 + $0x16] ss:$0 sm:$0xff] }
 0x32e   :  { %v330_v35 = vsel %vm327_vm9, %v329_v22, %v325_v29  ;;  %vm562_vm13 = vweird.f32 %v555_v59  ;;  %v315_v41 = vsel %vm312_vm12, %v314_v31, %v310_v33 }
 0x32f   :  { %v262_v0 = vmul.f32 %v259_v63, %v252_v62 }
 0x330   :  { %v255_v6 = vpop.permute.xlu2 %254 }
 0x331   :  { %v269_v5 = vrot.slane %v262_v0, 4  ;;  %v261_v7 = vmul.f32 %v255_v6, %v251_v3 }
 0x333   :  { %v270_v11 = vadd.f32 %v269_v5, %v262_v0  ;;  %v1031_v10 = vpop.eup %1030  ;;  %v263_v15 = vrot.slane %v261_v7, 4  ;;  %v1012_v0 = vld [vmem:[%s1297_s1 + $0x1a] ss:$0 sm:$0xff] }
 0x334   :  { %v557_v18 = vmul.f32 %v1031_v10, %v555_v59  ;;  %vm563_vm11 = vweird.f32 %v1031_v10 }
 0x335   :  { %v271_v17 = vrot.slane %v270_v11, 2  ;;  %v264_v19 = vadd.f32 %v263_v15, %v261_v7  ;;  %vm564_vm14 = vmor %vm562_vm13, %vm563_vm11 }
 0x336   :  { %v558_v2 = vmul.f32 %v1031_v10, %v557_v18 }
 0x337   :  { %v272_v21 = vadd.f32 %v271_v17, %v270_v11  ;;  %v265_v25 = vrot.slane %v264_v19, 2  ;;  %v774_v11 = vld [vmem:[%s1297_s1 + $0x17] sm:$0x1] }
 0x338   :  { %v559_v27 = vmul.f32 0.5, %v558_v2  ;;  %966 = vpush %v774_v11  ;;  %v1014_v2 = vld [vmem:[%s1297_s1 + $0x15] ss:$0 sm:$0xff] }
 0x339   :  { %v273_v28 = vrot.slane %v272_v21, 1  ;;  %v266_v30 = vadd.f32 %v265_v25, %v264_v19 }
 0x33a   :  { %v560_v32 = vsub.f32 1.5, %v559_v27 }
 0x33b   :  { %v274_v23 = vadd.f32 %v273_v28, %v272_v21  ;;  %v267_v34 = vrot.slane %v266_v30, 1 }
 0x33c   :  { %v561_v36 = vmul.f32 %v1031_v10, %v560_v32 }
 0x33d   :  { %v331_v37 = vmul.f32 %v330_v35, %v274_v23  ;;  %v268_v38 = vadd.f32 %v267_v34, %v266_v30 }
 0x33e   :  { %v565_v40 = vsel %vm564_vm14, %v1031_v10, %v561_v36 }
 0x33f   :  { %v566_v42 = vmul.f32 %v565_v40, %v1209_v9  ;;  %v316_v44 = vmul.f32 %v315_v41, %v268_v38  ;;  %v572_v45 = vpack.c.bf16 %v331_v37, %v331_v37  ;;  %v1011_v9 = vld [vmem:[%s1297_s1 + $0x13] ss:$0 sm:$0xff] }
 0x341   :  { %v568_v46 = vmul.f32 %v1009_v39, %v566_v42  ;;  %v571_v47 = vpack.c.bf16 %v316_v44, %v316_v44  ;;  %v672_v50 = vunpack.c.l.b16 %v572_v45 }
 0x343   :  { %v570_v48 = vadd.f32 %v1010_v43, %v568_v46  ;;  %v671_v49 = vunpack.c.l.b16 %v571_v47 }
 0x345   :  { %v590_v51 = vpack.c.bf16 %v570_v48, %v570_v48  ;;  %v673_v52 = vsel %vm351_vm0, %v672_v50, %v671_v49 }
 0x346   :  { %v674_v53 = vpack.c.b16 %v673_v52, %v673_v52 }
 0x347   :  { %664 = vmatmul.bf16.vlgmr.msra.gmra.mxu2 %v590_v51 }
 0x348   :  { %732 = vmatmul.bf16.vlgmr.msra.gmra.mxu3 %v674_v53 }
 0x369   :  { %s967_s22 = spop %966 }
 0x36a   :  { %v777_v14 = vstv %s967_s22 }
 0x3ca   :  { %v665_v55 = vpop.f32.mrf.mxu2 }
 0x3cb   :  { %v733_v56 = vpop.f32.mrf.mxu3 }
 0x3cc   :  { %v734_v57 = vadd.f32 %v733_v56, %v665_v55 }
 0x3ce   :  { %v739_v58 = vadd.f32 %v1011_v9, %v734_v57 }
 0x3d0   :  { %v740_v59 = vmax.f32 %v739_v58, 0.0 }
 0x3d2   :  { %v667_v60 = vpop.f32.mrf.mxu2  ;;  %v744_v54 = vsel %vm431_vm1, %v740_v59, 0.0 }
 0x3d3   :  { %v735_v62 = vpop.f32.mrf.mxu3  ;;  %745 = vadd.xlane.f32.xlu2 %v744_v54 }
 0x446   :  { %v746_v63 = vpop.xlane.xlu2 %745 }
 0x447   :  { %v747_v1 = vmul.f32 0.03125, %v746_v63 }
 0x449   :  { %v748_v3 = vsub.f32 %v740_v59, %v747_v1 }
 0x44b   :  { %v750_v61 = vmul.f32 %v1012_v0, %v748_v3 }
 0x44d   :  { %v751_v5 = vmul.f32 %v750_v61, %v750_v61 }
 0x44f   :  { %v752_v6 = vsel %vm431_vm1, %v751_v5, 0.0  ;;  %vm799_vm1 = vcmask 15360  }
 0x450   :  { %753 = vadd.xlane.f32.xlu1 %v752_v6 }
 0x4c3   :  { %v754_v7 = vpop.xlane.xlu1 %753 }
 0x4c4   :  { %v755_v10 = vmul.f32 0.03125, %v754_v7 }
 0x4c6   :  { %v756_v12 = vadd.f32 1e-05, %v755_v10 }
 0x4c8   :  { %1032 = vrsqrt.f32 %v756_v12  ;;  %vm763_vm15 = vweird.f32 %v756_v12 }
 0x4ce   :  { %v1033_v13 = vpop.eup %1032 }
 0x4cf   :  { %v758_v15 = vmul.f32 %v1033_v13, %v756_v12  ;;  %vm764_vm0 = vweird.f32 %v1033_v13 }
 0x4d0   :  { %vm765_vm2 = vmor %vm763_vm15, %vm764_vm0 }
 0x4d1   :  { %v759_v20 = vmul.f32 %v1033_v13, %v758_v15 }
 0x4d3   :  { %v760_v16 = vmul.f32 0.5, %v759_v20 }
 0x4d5   :  { %v761_v18 = vsub.f32 1.5, %v760_v16 }
 0x4d7   :  { %v762_v17 = vmul.f32 %v1033_v13, %v761_v18 }
 0x4d9   :  { %v766_v19 = vsel %vm765_vm2, %v1033_v13, %v762_v17 }
 0x4da   :  { %v767_v4 = vmul.f32 %v766_v19, %v750_v61 }
 0x4dc   :  { %v769_v21 = vmul.f32 %v1013_v8, %v767_v4 }
 0x4de   :  { %v771_v22 = vadd.f32 %v1014_v2, %v769_v21 }
 0x4e0   :  { %794 = vmatpush.xpose.msrb.mxu0 %v771_v22 }
 0x4e3   :  { %795 = vmatmul.f32.vlgmr.msrb.gmra.mxu0 %v1015_v24 }
 0x560   :  { %v796_v25 = vpop.f32.mrf.mxu0 }
 0x561   :  { %v797_v26 = vadd.f32 %v796_v25, %v777_v14 }
 0x563   :  { %800 = vst.msk [vmem:[%s1299_s3] sm:$0xff] %vm799_vm1, %v797_v26 }
 0x564   :  { %805 = vsyncpa [#allocation3], 1 }

</bundles_post_ra>
